<compile_context>
chip_gen: v6e
topology: v6e:2x2x1
jax: 0.10.0
libtpu: 0.0.40
codegen_flags: <defaults>
</compile_context>

<pallas_src>
import functools

import jax
import jax.numpy as jnp
from jax.experimental import pallas as pl
from jax.experimental.pallas import tpu as pltpu

NEG_SLOPE = 0.01  # LeakyReLU(0.01) == lrelu() in the reference code


def _round_up(x, m):
    return ((x + m - 1) // m) * m


def _mxu_is_256_wide():
    # v6e / v7x have a 2x256^2 MXU; v5e and older are 128-wide.  Only affects
    # the N tile choice, never correctness.
    try:
        kind = jax.devices()[0].device_kind.lower()
        return ("v6" in kind) or ("v7" in kind)
    except Exception:
        return False


# ----------------------------------------------------------------------------
# Pallas kernel: tiled GEMM + bias + (optional) LeakyReLU with f32 accumulator
# ----------------------------------------------------------------------------
def _gemm_bias_act_kernel(x_ref, w_ref, b_ref, o_ref, acc_ref, *, apply_act):
    # x_ref: (TM, TK) bf16, w_ref: (TK, TN) bf16, b_ref: (1, TN) f32,
    # o_ref: (TM, TN) f32/bf16, acc_ref: VMEM (TM, TN) f32.  Grid = (m, n, k),
    # k last.  Partial M tiles are safe: garbage rows in acc coming from
    # OOB-read input rows are never written back (Pallas masks OOB stores).
    @pl.when(pl.program_id(2) == 0)
    def _init():
        acc_ref[...] = jnp.zeros_like(acc_ref)

    acc_ref[...] += jnp.dot(x_ref[...], w_ref[...],
                            preferred_element_type=jnp.float32)

    @pl.when(pl.program_id(2) == pl.num_programs(2) - 1)
    def _finalize():
        acc = acc_ref[...] + b_ref[...]
        if apply_act:
            acc = jnp.where(acc >= 0.0, acc, NEG_SLOPE * acc)
        o_ref[...] = acc.astype(o_ref.dtype)


def _gemm_bias_act(patches, w_mat, b_row, *, apply_act, out_dtype, tm=512):
    """patches: (M, Kd) bf16, w_mat: (Kd, N_pad) bf16, b_row: (1, N_pad) f32.

    Returns (M, N_pad) `out_dtype`.  N_pad is a multiple of 128 (lane-dense).
    """
    M, Kd = patches.shape
    Kd_w, N_pad = w_mat.shape
    assert Kd == Kd_w and b_row.shape == (1, N_pad) and N_pad % 128 == 0

    # N tile: 256 matches the v6e/v7x MXU; 128 for v5e (128-wide MXU, 16 MiB
    # scoped VMEM, single vector-store slot) or when N_pad is only 128-aligned.
    TN = 256 if (N_pad % 256 == 0 and _mxu_is_256_wide()) else 128

    # K tile: whole K when moderate; otherwise the largest dividing multiple of
    # 128 <= 2048 so no runtime zero-pad copy of the patch matrix is needed.
    TK_MAX = 2048
    if Kd <= TK_MAX:
        TK = Kd
    else:
        TK = None
        for cand in range(TK_MAX, 127, -128):
            if Kd % cand == 0:
                TK = cand
                break
        if TK is None:  # rare fallback: pad K (extra HBM copy)
            TK = 1024
            kd_pad = _round_up(Kd, TK)
            patches = jnp.pad(patches, ((0, 0), (0, kd_pad - Kd)))
            w_mat = jnp.pad(w_mat, ((0, kd_pad - Kd), (0, 0)))
            Kd = kd_pad

    TM = min(tm, M)
    m_tiles = pl.cdiv(M, TM)
    n_tiles = N_pad // TN
    # v7x shards the "parallel" grid axes over its 2 TensorCores: guarantee at
    # least 2 parallel tiles when M allows it (late layers / heads).
    if m_tiles * n_tiles == 1 and M >= 16:
        TM = _round_up(pl.cdiv(M, 2), 8)
        m_tiles = pl.cdiv(M, TM)
    # If the call would still be a single grid step, split K so the software
    # pipeline has something to overlap (weight/patch DMA hides behind the MXU).
    if m_tiles * n_tiles == 1 and Kd == TK and TK % 256 == 0 and TK >= 512:
        TK = TK // 2

    grid = (m_tiles, n_tiles, Kd // TK)

    kernel = functools.partial(_gemm_bias_act_kernel, apply_act=apply_act)
    return pl.pallas_call(
        kernel,
        grid=grid,
        in_specs=[
            pl.BlockSpec((TM, TK), lambda m, n, k: (m, k)),
            pl.BlockSpec((TK, TN), lambda m, n, k: (k, n)),
            pl.BlockSpec((1, TN), lambda m, n, k: (0, n)),
        ],
        out_specs=pl.BlockSpec((TM, TN), lambda m, n, k: (m, n)),
        out_shape=jax.ShapeDtypeStruct((M, N_pad), out_dtype),
        scratch_shapes=[pltpu.VMEM((TM, TN), jnp.float32)],
        compiler_params=pltpu.CompilerParams(
            dimension_semantics=("parallel", "parallel", "arbitrary")),
    )(patches, w_mat, b_row)


# ----------------------------------------------------------------------------
# Conv2d = im2col (bf16) + fused Pallas GEMM
# ----------------------------------------------------------------------------
def _im2col(xp, K, stride, Ho, Wo):
    """xp: zero-padded bf16 NHWC input -> (B*Ho*Wo, K*K*Cin) bf16 patches."""
    # TODO(synk): read strided windows of xp directly inside the kernel
    # (pl.ANY HBM ref + manual DMA over a (kh, kw) grid axis) to remove this
    # HBM-materialized im2col (K^2/stride^2 read/write amplification).
    B, _, _, Cin = xp.shape
    cols = []
    for kh in range(K):
        for kw in range(K):
            sl = jax.lax.slice(
                xp,
                (0, kh, kw, 0),
                (B, kh + stride * (Ho - 1) + 1, kw + stride * (Wo - 1) + 1, Cin),
                (1, stride, stride, 1),
            )  # (B, Ho, Wo, Cin)
            cols.append(sl)
    return jnp.concatenate(cols, axis=-1).reshape(B * Ho * Wo, K * K * Cin)


def _prep_conv(w_oihw, bias, *, stride, padding):
    """Precompute GEMM-form (128-padded, bf16) weights + padded f32 bias once."""
    Cout, Cin, K, K2 = w_oihw.shape
    assert K == K2
    n_pad = _round_up(Cout, 128)  # lane-dense output stores
    wm = jnp.transpose(w_oihw, (2, 3, 1, 0)).reshape(K * K * Cin, Cout)
    wm = jnp.pad(wm, ((0, 0), (0, n_pad - Cout))).astype(jnp.bfloat16)
    if bias is None:
        bias = jnp.zeros((Cout,), jnp.float32)
    br = jnp.pad(bias.astype(jnp.float32), (0, n_pad - Cout)).reshape(1, n_pad)
    return dict(w=wm, b=br, K=K, stride=stride, padding=padding,
                Cout=Cout, Cin=Cin, n_pad=n_pad)


def conv2d_pallas(x_nhwc, cfg, *, apply_act, out_dtype=jnp.float32):
    """PyTorch-semantics Conv2d (+ optional LeakyReLU) with the GEMM in Pallas."""
    B, H, W, Cin = x_nhwc.shape
    K, stride, padding, Cout = cfg["K"], cfg["stride"], cfg["padding"], cfg["Cout"]
    assert Cin == cfg["Cin"]
    Ho = (H + 2 * padding - K) // stride + 1
    Wo = (W + 2 * padding - K) // stride + 1

    # Cast to bf16 BEFORE padding/im2col: halves the patch-matrix HBM traffic.
    # (No-op for bf16 intermediate activations from previous layers.)
    xp = x_nhwc.astype(jnp.bfloat16)
    if padding:
        xp = jnp.pad(xp, ((0, 0), (padding, padding), (padding, padding), (0, 0)))
    patches = _im2col(xp, K, stride, Ho, Wo)  # (M, K*K*Cin) bf16
    out = _gemm_bias_act(patches, cfg["w"], cfg["b"],
                         apply_act=apply_act, out_dtype=out_dtype)
    if cfg["n_pad"] != Cout:
        out = out[:, :Cout]
    return out.reshape(B, Ho, Wo, Cout)


# ----------------------------------------------------------------------------
# Discriminator: parameters + forward
# ----------------------------------------------------------------------------
def init_discriminator_params(key, *, image_size, conv_dim, c_dim, repeat_num,
                              num_channels):
    """Deterministic synthetic init mirroring the module's __init__ shapes."""
    params = {"convs": []}
    in_c, out_c = num_channels, conv_dim
    keys = jax.random.split(key, 2 * repeat_num + 2)
    ki = 0
    for _ in range(repeat_num):
        fan_in = in_c * 4 * 4
        bound = 1.0 / jnp.sqrt(fan_in)
        w = jax.random.uniform(keys[ki], (out_c, in_c, 4, 4), jnp.float32, -bound, bound)
        b = jax.random.uniform(keys[ki + 1], (out_c,), jnp.float32, -bound, bound)
        params["convs"].append((w, b))
        ki += 2
        in_c, out_c = out_c, out_c * 2
    curr_dim = in_c
    ks = image_size // (2 ** repeat_num)
    bound1 = 1.0 / jnp.sqrt(curr_dim * 3 * 3)
    bound2 = 1.0 / jnp.sqrt(curr_dim * ks * ks)
    params["conv1_w"] = jax.random.uniform(
        keys[ki], (1, curr_dim, 3, 3), jnp.float32, -bound1, bound1)
    params["conv2_w"] = jax.random.uniform(
        keys[ki + 1], (c_dim, curr_dim, ks, ks), jnp.float32, -bound2, bound2)
    return params


def make_discriminator_forward(params, *, n_feature_layers):
    """Precompute GEMM-form weights once, return a jitted forward(x_nchw)."""
    # TODO(synk): AttnLayer (use_attention=True) has no implementation here; the
    # default config (use_attention=False) never instantiates it.
    conv_cfgs = [_prep_conv(w, b, stride=2, padding=1) for (w, b) in params["convs"]]
    head_src = _prep_conv(params["conv1_w"], None, stride=1, padding=1)
    head_cls = _prep_conv(params["conv2_w"], None, stride=1, padding=0)

    def forward(x_nchw):
        h = jnp.transpose(x_nchw, (0, 2, 3, 1))  # NCHW -> NHWC (boundary only)
        feat_last = None
        for li, cfg in enumerate(conv_cfgs):
            # Intermediate activations kept bf16: the next layer's GEMM reads
            # bf16 anyway, so this is pure HBM-bandwidth savings.
            h = conv2d_pallas(h, cfg, apply_act=True, out_dtype=jnp.bfloat16)
            if li == n_feature_layers - 1:
                feat_last = h
        # h is now main(features[-1])
        out_src = conv2d_pallas(h, head_src, apply_act=False, out_dtype=jnp.float32)
        out_cls = conv2d_pallas(h, head_cls, apply_act=False, out_dtype=jnp.float32)
        out_src = jnp.transpose(out_src, (0, 3, 1, 2))        # back to NCHW
        out_cls = out_cls.reshape(out_cls.shape[0], -1)       # (B, c_dim); Ho=Wo=1
        feat_last = jnp.transpose(feat_last, (0, 3, 1, 2)).astype(jnp.float32)
        return out_src, out_cls, [feat_last]

    return jax.jit(forward)


# ----------------------------------------------------------------------------
# Pure-JAX reference (for a correctness sanity check)
# ----------------------------------------------------------------------------
def _conv_ref(x_nhwc, w_oihw, bias, stride, padding, apply_act):
    out = jax.lax.conv_general_dilated(
        x_nhwc, jnp.transpose(w_oihw, (2, 3, 1, 0)),
        window_strides=(stride, stride),
        padding=[(padding, padding), (padding, padding)],
        dimension_numbers=("NHWC", "HWIO", "NHWC"),
        precision=jax.lax.Precision.HIGHEST,
    )
    if bias is not None:
        out = out + bias
    if apply_act:
        out = jnp.where(out >= 0.0, out, NEG_SLOPE * out)
    return out


def _forward_ref(params, x_nchw, *, n_feature_layers):
    h = jnp.transpose(x_nchw, (0, 2, 3, 1))
    feat_last = None
    for li, (w, b) in enumerate(params["convs"]):
        h = _conv_ref(h, w, b, 2, 1, True)
        if li == n_feature_layers - 1:
            feat_last = h
    out_src = _conv_ref(h, params["conv1_w"], None, 1, 1, False)
    out_cls = _conv_ref(h, params["conv2_w"], None, 1, 0, False)
    return (jnp.transpose(out_src, (0, 3, 1, 2)),
            out_cls.reshape(out_cls.shape[0], -1),
            [jnp.transpose(feat_last, (0, 3, 1, 2))])


# ----------------------------------------------------------------------------
if __name__ == "__main__":
    # Small, self-consistent config (PyTorch defaults scaled down):
    #   image_size=16, conv_dim=8, c_dim=5, repeat_num=3, num_channels=3,
    #   n_feature_layers=2, activation='lrelu', use_attention=False.
    IMAGE_SIZE, CONV_DIM, C_DIM, REPEAT_NUM, NUM_CH, NFEAT = 16, 8, 5, 3, 3, 2
    B = 2

    key = jax.random.PRNGKey(0)
    k_param, k_x = jax.random.split(key)
    params = init_discriminator_params(
        k_param, image_size=IMAGE_SIZE, conv_dim=CONV_DIM, c_dim=C_DIM,
        repeat_num=REPEAT_NUM, num_channels=NUM_CH)

    x = jax.random.normal(k_x, (B, NUM_CH, IMAGE_SIZE, IMAGE_SIZE), jnp.float32)

    forward = make_discriminator_forward(params, n_feature_layers=NFEAT)
    out_src, out_cls, feats = forward(x)
    jax.block_until_ready((out_src, out_cls, feats))

    # shape checks (mirror PyTorch semantics)
    assert out_src.shape == (B, 1, IMAGE_SIZE // 2 ** REPEAT_NUM,
                             IMAGE_SIZE // 2 ** REPEAT_NUM)
    assert out_cls.shape == (B, C_DIM)
    assert feats[0].shape == (B, CONV_DIM * 2 ** (NFEAT - 1),
                              IMAGE_SIZE // 2 ** NFEAT, IMAGE_SIZE // 2 ** NFEAT)

    # numeric check against the f32 HIGHEST-precision reference.
    # (Pallas path uses bf16 MXU operands / bf16 intermediate activations with
    #  f32 accumulation -> relaxed tolerance.)
    r_src, r_cls, r_feats = _forward_ref(params, x, n_feature_layers=NFEAT)
    for a, b in ((out_src, r_src), (out_cls, r_cls), (feats[0], r_feats[0])):
        assert jnp.allclose(a, b, rtol=5e-2, atol=1e-2), "mismatch vs reference"

    print("KERNEL_OK")
</pallas_src>

<mosaic_0001>
module attributes {stable_mosaic.version = 11 : i64} {
  func.func @_gemm_bias_act_kernel(%arg0: i32, %arg1: i32, %arg2: i32, %arg3: memref<64x48xbf16, #tpu.memory_space<vmem>>, %arg4: memref<48x128xbf16, #tpu.memory_space<vmem>>, %arg5: memref<1x128xf32, #tpu.memory_space<vmem>>, %arg6: memref<64x128xbf16, #tpu.memory_space<vmem>>, %arg7: memref<64x128xf32, #tpu.memory_space<vmem>>) attributes {dimension_semantics = [#tpu.dimension_semantics<parallel>, #tpu.dimension_semantics<parallel>, #tpu.dimension_semantics<arbitrary>], iteration_bounds = array<i64: 2, 1, 1>, scalar_prefetch = 0 : i64, scratch_operands = 1 : i64, tpu.core_type = #tpu.core_type<tc>, window_params = [{transform_indices = @transform_0, window_bounds = array<i64: 64, 48>}, {transform_indices = @transform_1, window_bounds = array<i64: 48, 128>}, {transform_indices = @transform_2, window_bounds = array<i64: 1, 128>}, {transform_indices = @transform_3, window_bounds = array<i64: 64, 128>}]} {
    %c0_i32 = arith.constant 0 : i32
    %0 = arith.cmpi eq, %arg2, %c0_i32 : i32
    %1 = arith.extui %0 : i1 to i32
    %c0_i32_0 = arith.constant 0 : i32
    %2 = arith.cmpi ne, %1, %c0_i32_0 : i32
    scf.if %2 {
      %cst_10 = arith.constant 0.000000e+00 : f32
      %12 = vector.broadcast %cst_10 : f32 to vector<64x128xf32>
      %c0_11 = arith.constant 0 : index
      %c0_12 = arith.constant 0 : index
      %13 = vector.load %arg7[%c0_11, %c0_12] : memref<64x128xf32, #tpu.memory_space<vmem>>, vector<64x128xf32>
      tpu.vector_store %arg7[%c0_11, %c0_12], %12 {strides = array<i32>} : memref<64x128xf32, #tpu.memory_space<vmem>>, vector<64x128xf32>,
    } else {
    }
    %c0 = arith.constant 0 : index
    %c0_1 = arith.constant 0 : index
    %3 = vector.load %arg7[%c0, %c0_1] : memref<64x128xf32, #tpu.memory_space<vmem>>, vector<64x128xf32>
    %c0_2 = arith.constant 0 : index
    %c0_3 = arith.constant 0 : index
    %4 = vector.load %arg3[%c0_2, %c0_3] : memref<64x48xbf16, #tpu.memory_space<vmem>>, vector<64x48xbf16>
    %c0_4 = arith.constant 0 : index
    %c0_5 = arith.constant 0 : index
    %5 = vector.load %arg4[%c0_4, %c0_5] : memref<48x128xbf16, #tpu.memory_space<vmem>>, vector<48x128xbf16>
    %cst = arith.constant dense<0.000000e+00> : vector<64x128xf32>
    %6 = tpu.matmul %4, %5, %cst {dimension_numbers = #tpu.dot_dimension_numbers<[1], [0], [0], [1], [0, 0, 1, 1], [], []>} : vector<64x48xbf16>, vector<48x128xbf16>, vector<64x128xf32> -> vector<64x128xf32>
    %7 = arith.addf %3, %6 : vector<64x128xf32>
    %c0_6 = arith.constant 0 : index
    %c0_7 = arith.constant 0 : index
    %8 = vector.load %arg7[%c0_6, %c0_7] : memref<64x128xf32, #tpu.memory_space<vmem>>, vector<64x128xf32>
    tpu.vector_store %arg7[%c0_6, %c0_7], %7 {strides = array<i32>} : memref<64x128xf32, #tpu.memory_space<vmem>>, vector<64x128xf32>,
    %c0_i32_8 = arith.constant 0 : i32
    %9 = arith.cmpi eq, %arg2, %c0_i32_8 : i32
    %10 = arith.extui %9 : i1 to i32
    %c0_i32_9 = arith.constant 0 : i32
    %11 = arith.cmpi ne, %10, %c0_i32_9 : i32
    scf.if %11 {
      %c0_10 = arith.constant 0 : index
      %c0_11 = arith.constant 0 : index
      %12 = vector.load %arg7[%c0_10, %c0_11] : memref<64x128xf32, #tpu.memory_space<vmem>>, vector<64x128xf32>
      %c0_12 = arith.constant 0 : index
      %c0_13 = arith.constant 0 : index
      %13 = vector.load %arg5[%c0_12, %c0_13] : memref<1x128xf32, #tpu.memory_space<vmem>>, vector<1x128xf32>
      %14 = vector.broadcast %13 : vector<1x128xf32> to vector<64x128xf32>
      %15 = arith.addf %12, %14 : vector<64x128xf32>
      %cst_14 = arith.constant 0.000000e+00 : f32
      %16 = vector.broadcast %cst_14 : f32 to vector<64x128xf32>
      %17 = arith.cmpf oge, %15, %16 : vector<64x128xf32>
      %cst_15 = arith.constant 0.00999999977 : f32
      %18 = vector.broadcast %cst_15 : f32 to vector<64x128xf32>
      %19 = arith.mulf %18, %15 : vector<64x128xf32>
      %20 = arith.select %17, %15, %19 : vector<64x128xi1>, vector<64x128xf32>
      %21 = arith.truncf %20 : vector<64x128xf32> to vector<64x128xbf16>
      %c0_16 = arith.constant 0 : index
      %c0_17 = arith.constant 0 : index
      %22 = vector.load %arg6[%c0_16, %c0_17] : memref<64x128xbf16, #tpu.memory_space<vmem>>, vector<64x128xbf16>
      tpu.vector_store %arg6[%c0_16, %c0_17], %21 {strides = array<i32>} : memref<64x128xbf16, #tpu.memory_space<vmem>>, vector<64x128xbf16>,
    } else {
    }
    return
  }
  func.func @transform_0(%arg0: i32, %arg1: i32, %arg2: i32) -> (i32, i32) {
    %c0_i32 = arith.constant 0 : i32
    return %arg0, %arg2 : i32, i32
  }
  func.func @transform_1(%arg0: i32, %arg1: i32, %arg2: i32) -> (i32, i32) {
    %c0_i32 = arith.constant 0 : i32
    return %arg2, %arg1 : i32, i32
  }
  func.func @transform_2(%arg0: i32, %arg1: i32, %arg2: i32) -> (i32, i32) {
    %c0_i32 = arith.constant 0 : i32
    %c0_i32_0 = arith.constant 0 : i32
    return %c0_i32, %arg1 : i32, i32
  }
  func.func @transform_3(%arg0: i32, %arg1: i32, %arg2: i32) -> (i32, i32) {
    %c0_i32 = arith.constant 0 : i32
    return %arg0, %arg1 : i32, i32
  }
}

module attributes {stable_mosaic.version = 11 : i64} {
  func.func @_gemm_bias_act_kernel(%arg0: i32, %arg1: i32, %arg2: i32, %arg3: memref<16x128xbf16, #tpu.memory_space<vmem>>, %arg4: memref<128x128xbf16, #tpu.memory_space<vmem>>, %arg5: memref<1x128xf32, #tpu.memory_space<vmem>>, %arg6: memref<16x128xbf16, #tpu.memory_space<vmem>>, %arg7: memref<16x128xf32, #tpu.memory_space<vmem>>) attributes {dimension_semantics = [#tpu.dimension_semantics<parallel>, #tpu.dimension_semantics<parallel>, #tpu.dimension_semantics<arbitrary>], iteration_bounds = array<i64: 2, 1, 1>, scalar_prefetch = 0 : i64, scratch_operands = 1 : i64, tpu.core_type = #tpu.core_type<tc>, window_params = [{transform_indices = @transform_0, window_bounds = array<i64: 16, 128>}, {transform_indices = @transform_1, window_bounds = array<i64: 128, 128>}, {transform_indices = @transform_2, window_bounds = array<i64: 1, 128>}, {transform_indices = @transform_3, window_bounds = array<i64: 16, 128>}]} {
    %c0_i32 = arith.constant 0 : i32
    %0 = arith.cmpi eq, %arg2, %c0_i32 : i32
    %1 = arith.extui %0 : i1 to i32
    %c0_i32_0 = arith.constant 0 : i32
    %2 = arith.cmpi ne, %1, %c0_i32_0 : i32
    scf.if %2 {
      %cst_10 = arith.constant 0.000000e+00 : f32
      %12 = vector.broadcast %cst_10 : f32 to vector<16x128xf32>
      %c0_11 = arith.constant 0 : index
      %c0_12 = arith.constant 0 : index
      %13 = vector.load %arg7[%c0_11, %c0_12] : memref<16x128xf32, #tpu.memory_space<vmem>>, vector<16x128xf32>
      tpu.vector_store %arg7[%c0_11, %c0_12], %12 {strides = array<i32>} : memref<16x128xf32, #tpu.memory_space<vmem>>, vector<16x128xf32>,
    } else {
    }
    %c0 = arith.constant 0 : index
    %c0_1 = arith.constant 0 : index
    %3 = vector.load %arg7[%c0, %c0_1] : memref<16x128xf32, #tpu.memory_space<vmem>>, vector<16x128xf32>
    %c0_2 = arith.constant 0 : index
    %c0_3 = arith.constant 0 : index
    %4 = vector.load %arg3[%c0_2, %c0_3] : memref<16x128xbf16, #tpu.memory_space<vmem>>, vector<16x128xbf16>
    %c0_4 = arith.constant 0 : index
    %c0_5 = arith.constant 0 : index
    %5 = vector.load %arg4[%c0_4, %c0_5] : memref<128x128xbf16, #tpu.memory_space<vmem>>, vector<128x128xbf16>
    %cst = arith.constant dense<0.000000e+00> : vector<16x128xf32>
    %6 = tpu.matmul %4, %5, %cst {dimension_numbers = #tpu.dot_dimension_numbers<[1], [0], [0], [1], [0, 0, 1, 1], [], []>} : vector<16x128xbf16>, vector<128x128xbf16>, vector<16x128xf32> -> vector<16x128xf32>
    %7 = arith.addf %3, %6 : vector<16x128xf32>
    %c0_6 = arith.constant 0 : index
    %c0_7 = arith.constant 0 : index
    %8 = vector.load %arg7[%c0_6, %c0_7] : memref<16x128xf32, #tpu.memory_space<vmem>>, vector<16x128xf32>
    tpu.vector_store %arg7[%c0_6, %c0_7], %7 {strides = array<i32>} : memref<16x128xf32, #tpu.memory_space<vmem>>, vector<16x128xf32>,
    %c0_i32_8 = arith.constant 0 : i32
    %9 = arith.cmpi eq, %arg2, %c0_i32_8 : i32
    %10 = arith.extui %9 : i1 to i32
    %c0_i32_9 = arith.constant 0 : i32
    %11 = arith.cmpi ne, %10, %c0_i32_9 : i32
    scf.if %11 {
      %c0_10 = arith.constant 0 : index
      %c0_11 = arith.constant 0 : index
      %12 = vector.load %arg7[%c0_10, %c0_11] : memref<16x128xf32, #tpu.memory_space<vmem>>, vector<16x128xf32>
      %c0_12 = arith.constant 0 : index
      %c0_13 = arith.constant 0 : index
      %13 = vector.load %arg5[%c0_12, %c0_13] : memref<1x128xf32, #tpu.memory_space<vmem>>, vector<1x128xf32>
      %14 = vector.broadcast %13 : vector<1x128xf32> to vector<16x128xf32>
      %15 = arith.addf %12, %14 : vector<16x128xf32>
      %cst_14 = arith.constant 0.000000e+00 : f32
      %16 = vector.broadcast %cst_14 : f32 to vector<16x128xf32>
      %17 = arith.cmpf oge, %15, %16 : vector<16x128xf32>
      %cst_15 = arith.constant 0.00999999977 : f32
      %18 = vector.broadcast %cst_15 : f32 to vector<16x128xf32>
      %19 = arith.mulf %18, %15 : vector<16x128xf32>
      %20 = arith.select %17, %15, %19 : vector<16x128xi1>, vector<16x128xf32>
      %21 = arith.truncf %20 : vector<16x128xf32> to vector<16x128xbf16>
      %c0_16 = arith.constant 0 : index
      %c0_17 = arith.constant 0 : index
      %22 = vector.load %arg6[%c0_16, %c0_17] : memref<16x128xbf16, #tpu.memory_space<vmem>>, vector<16x128xbf16>
      tpu.vector_store %arg6[%c0_16, %c0_17], %21 {strides = array<i32>} : memref<16x128xbf16, #tpu.memory_space<vmem>>, vector<16x128xbf16>,
    } else {
    }
    return
  }
  func.func @transform_0(%arg0: i32, %arg1: i32, %arg2: i32) -> (i32, i32) {
    %c0_i32 = arith.constant 0 : i32
    return %arg0, %arg2 : i32, i32
  }
  func.func @transform_1(%arg0: i32, %arg1: i32, %arg2: i32) -> (i32, i32) {
    %c0_i32 = arith.constant 0 : i32
    return %arg2, %arg1 : i32, i32
  }
  func.func @transform_2(%arg0: i32, %arg1: i32, %arg2: i32) -> (i32, i32) {
    %c0_i32 = arith.constant 0 : i32
    %c0_i32_0 = arith.constant 0 : i32
    return %c0_i32, %arg1 : i32, i32
  }
  func.func @transform_3(%arg0: i32, %arg1: i32, %arg2: i32) -> (i32, i32) {
    %c0_i32 = arith.constant 0 : i32
    return %arg0, %arg1 : i32, i32
  }
}

module attributes {stable_mosaic.version = 11 : i64} {
  func.func @_gemm_bias_act_kernel(%arg0: i32, %arg1: i32, %arg2: i32, %arg3: memref<8x256xbf16, #tpu.memory_space<vmem>>, %arg4: memref<256x128xbf16, #tpu.memory_space<vmem>>, %arg5: memref<1x128xf32, #tpu.memory_space<vmem>>, %arg6: memref<8x128xbf16, #tpu.memory_space<vmem>>, %arg7: memref<8x128xf32, #tpu.memory_space<vmem>>) attributes {dimension_semantics = [#tpu.dimension_semantics<parallel>, #tpu.dimension_semantics<parallel>, #tpu.dimension_semantics<arbitrary>], iteration_bounds = array<i64: 1, 1, 1>, scalar_prefetch = 0 : i64, scratch_operands = 1 : i64, tpu.core_type = #tpu.core_type<tc>, window_params = [{transform_indices = @transform_0, window_bounds = array<i64: 8, 256>}, {transform_indices = @transform_1, window_bounds = array<i64: 256, 128>}, {transform_indices = @transform_2, window_bounds = array<i64: 1, 128>}, {transform_indices = @transform_3, window_bounds = array<i64: 8, 128>}]} {
    %c0_i32 = arith.constant 0 : i32
    %0 = arith.cmpi eq, %arg2, %c0_i32 : i32
    %1 = arith.extui %0 : i1 to i32
    %c0_i32_0 = arith.constant 0 : i32
    %2 = arith.cmpi ne, %1, %c0_i32_0 : i32
    scf.if %2 {
      %cst_10 = arith.constant 0.000000e+00 : f32
      %12 = vector.broadcast %cst_10 : f32 to vector<8x128xf32>
      %c0_11 = arith.constant 0 : index
      %c0_12 = arith.constant 0 : index
      %13 = vector.load %arg7[%c0_11, %c0_12] : memref<8x128xf32, #tpu.memory_space<vmem>>, vector<8x128xf32>
      tpu.vector_store %arg7[%c0_11, %c0_12], %12 {strides = array<i32>} : memref<8x128xf32, #tpu.memory_space<vmem>>, vector<8x128xf32>,
    } else {
    }
    %c0 = arith.constant 0 : index
    %c0_1 = arith.constant 0 : index
    %3 = vector.load %arg7[%c0, %c0_1] : memref<8x128xf32, #tpu.memory_space<vmem>>, vector<8x128xf32>
    %c0_2 = arith.constant 0 : index
    %c0_3 = arith.constant 0 : index
    %4 = vector.load %arg3[%c0_2, %c0_3] : memref<8x256xbf16, #tpu.memory_space<vmem>>, vector<8x256xbf16>
    %c0_4 = arith.constant 0 : index
    %c0_5 = arith.constant 0 : index
    %5 = vector.load %arg4[%c0_4, %c0_5] : memref<256x128xbf16, #tpu.memory_space<vmem>>, vector<256x128xbf16>
    %cst = arith.constant dense<0.000000e+00> : vector<8x128xf32>
    %6 = tpu.matmul %4, %5, %cst {dimension_numbers = #tpu.dot_dimension_numbers<[1], [0], [0], [1], [0, 0, 1, 1], [], []>} : vector<8x256xbf16>, vector<256x128xbf16>, vector<8x128xf32> -> vector<8x128xf32>
    %7 = arith.addf %3, %6 : vector<8x128xf32>
    %c0_6 = arith.constant 0 : index
    %c0_7 = arith.constant 0 : index
    %8 = vector.load %arg7[%c0_6, %c0_7] : memref<8x128xf32, #tpu.memory_space<vmem>>, vector<8x128xf32>
    tpu.vector_store %arg7[%c0_6, %c0_7], %7 {strides = array<i32>} : memref<8x128xf32, #tpu.memory_space<vmem>>, vector<8x128xf32>,
    %c0_i32_8 = arith.constant 0 : i32
    %9 = arith.cmpi eq, %arg2, %c0_i32_8 : i32
    %10 = arith.extui %9 : i1 to i32
    %c0_i32_9 = arith.constant 0 : i32
    %11 = arith.cmpi ne, %10, %c0_i32_9 : i32
    scf.if %11 {
      %c0_10 = arith.constant 0 : index
      %c0_11 = arith.constant 0 : index
      %12 = vector.load %arg7[%c0_10, %c0_11] : memref<8x128xf32, #tpu.memory_space<vmem>>, vector<8x128xf32>
      %c0_12 = arith.constant 0 : index
      %c0_13 = arith.constant 0 : index
      %13 = vector.load %arg5[%c0_12, %c0_13] : memref<1x128xf32, #tpu.memory_space<vmem>>, vector<1x128xf32>
      %14 = vector.broadcast %13 : vector<1x128xf32> to vector<8x128xf32>
      %15 = arith.addf %12, %14 : vector<8x128xf32>
      %cst_14 = arith.constant 0.000000e+00 : f32
      %16 = vector.broadcast %cst_14 : f32 to vector<8x128xf32>
      %17 = arith.cmpf oge, %15, %16 : vector<8x128xf32>
      %cst_15 = arith.constant 0.00999999977 : f32
      %18 = vector.broadcast %cst_15 : f32 to vector<8x128xf32>
      %19 = arith.mulf %18, %15 : vector<8x128xf32>
      %20 = arith.select %17, %15, %19 : vector<8x128xi1>, vector<8x128xf32>
      %21 = arith.truncf %20 : vector<8x128xf32> to vector<8x128xbf16>
      %c0_16 = arith.constant 0 : index
      %c0_17 = arith.constant 0 : index
      %22 = vector.load %arg6[%c0_16, %c0_17] : memref<8x128xbf16, #tpu.memory_space<vmem>>, vector<8x128xbf16>
      tpu.vector_store %arg6[%c0_16, %c0_17], %21 {strides = array<i32>} : memref<8x128xbf16, #tpu.memory_space<vmem>>, vector<8x128xbf16>,
    } else {
    }
    return
  }
  func.func @transform_0(%arg0: i32, %arg1: i32, %arg2: i32) -> (i32, i32) {
    %c0_i32 = arith.constant 0 : i32
    return %arg0, %arg2 : i32, i32
  }
  func.func @transform_1(%arg0: i32, %arg1: i32, %arg2: i32) -> (i32, i32) {
    %c0_i32 = arith.constant 0 : i32
    return %arg2, %arg1 : i32, i32
  }
  func.func @transform_2(%arg0: i32, %arg1: i32, %arg2: i32) -> (i32, i32) {
    %c0_i32 = arith.constant 0 : i32
    %c0_i32_0 = arith.constant 0 : i32
    return %c0_i32, %arg1 : i32, i32
  }
  func.func @transform_3(%arg0: i32, %arg1: i32, %arg2: i32) -> (i32, i32) {
    %c0_i32 = arith.constant 0 : i32
    return %arg0, %arg1 : i32, i32
  }
}

module attributes {stable_mosaic.version = 11 : i64} {
  func.func @_gemm_bias_act_kernel(%arg0: i32, %arg1: i32, %arg2: i32, %arg3: memref<2x128xbf16, #tpu.memory_space<vmem>>, %arg4: memref<128x128xbf16, #tpu.memory_space<vmem>>, %arg5: memref<1x128xf32, #tpu.memory_space<vmem>>, %arg6: memref<2x128xf32, #tpu.memory_space<vmem>>, %arg7: memref<2x128xf32, #tpu.memory_space<vmem>>) attributes {dimension_semantics = [#tpu.dimension_semantics<parallel>, #tpu.dimension_semantics<parallel>, #tpu.dimension_semantics<arbitrary>], iteration_bounds = array<i64: 1, 1, 1>, scalar_prefetch = 0 : i64, scratch_operands = 1 : i64, tpu.core_type = #tpu.core_type<tc>, window_params = [{transform_indices = @transform_0, window_bounds = array<i64: 2, 128>}, {transform_indices = @transform_1, window_bounds = array<i64: 128, 128>}, {transform_indices = @transform_2, window_bounds = array<i64: 1, 128>}, {transform_indices = @transform_3, window_bounds = array<i64: 2, 128>}]} {
    %c0_i32 = arith.constant 0 : i32
    %0 = arith.cmpi eq, %arg2, %c0_i32 : i32
    %1 = arith.extui %0 : i1 to i32
    %c0_i32_0 = arith.constant 0 : i32
    %2 = arith.cmpi ne, %1, %c0_i32_0 : i32
    scf.if %2 {
      %cst_10 = arith.constant 0.000000e+00 : f32
      %12 = vector.broadcast %cst_10 : f32 to vector<2x128xf32>
      %c0_11 = arith.constant 0 : index
      %c0_12 = arith.constant 0 : index
      %13 = vector.load %arg7[%c0_11, %c0_12] : memref<2x128xf32, #tpu.memory_space<vmem>>, vector<2x128xf32>
      tpu.vector_store %arg7[%c0_11, %c0_12], %12 {strides = array<i32>} : memref<2x128xf32, #tpu.memory_space<vmem>>, vector<2x128xf32>,
    } else {
    }
    %c0 = arith.constant 0 : index
    %c0_1 = arith.constant 0 : index
    %3 = vector.load %arg7[%c0, %c0_1] : memref<2x128xf32, #tpu.memory_space<vmem>>, vector<2x128xf32>
    %c0_2 = arith.constant 0 : index
    %c0_3 = arith.constant 0 : index
    %4 = vector.load %arg3[%c0_2, %c0_3] : memref<2x128xbf16, #tpu.memory_space<vmem>>, vector<2x128xbf16>
    %c0_4 = arith.constant 0 : index
    %c0_5 = arith.constant 0 : index
    %5 = vector.load %arg4[%c0_4, %c0_5] : memref<128x128xbf16, #tpu.memory_space<vmem>>, vector<128x128xbf16>
    %cst = arith.constant dense<0.000000e+00> : vector<2x128xf32>
    %6 = tpu.matmul %4, %5, %cst {dimension_numbers = #tpu.dot_dimension_numbers<[1], [0], [0], [1], [0, 0, 1, 1], [], []>} : vector<2x128xbf16>, vector<128x128xbf16>, vector<2x128xf32> -> vector<2x128xf32>
    %7 = arith.addf %3, %6 : vector<2x128xf32>
    %c0_6 = arith.constant 0 : index
    %c0_7 = arith.constant 0 : index
    %8 = vector.load %arg7[%c0_6, %c0_7] : memref<2x128xf32, #tpu.memory_space<vmem>>, vector<2x128xf32>
    tpu.vector_store %arg7[%c0_6, %c0_7], %7 {strides = array<i32>} : memref<2x128xf32, #tpu.memory_space<vmem>>, vector<2x128xf32>,
    %c0_i32_8 = arith.constant 0 : i32
    %9 = arith.cmpi eq, %arg2, %c0_i32_8 : i32
    %10 = arith.extui %9 : i1 to i32
    %c0_i32_9 = arith.constant 0 : i32
    %11 = arith.cmpi ne, %10, %c0_i32_9 : i32
    scf.if %11 {
      %c0_10 = arith.constant 0 : index
      %c0_11 = arith.constant 0 : index
      %12 = vector.load %arg7[%c0_10, %c0_11] : memref<2x128xf32, #tpu.memory_space<vmem>>, vector<2x128xf32>
      %c0_12 = arith.constant 0 : index
      %c0_13 = arith.constant 0 : index
      %13 = vector.load %arg5[%c0_12, %c0_13] : memref<1x128xf32, #tpu.memory_space<vmem>>, vector<1x128xf32>
      %14 = vector.broadcast %13 : vector<1x128xf32> to vector<2x128xf32>
      %15 = arith.addf %12, %14 : vector<2x128xf32>
      %c0_14 = arith.constant 0 : index
      %c0_15 = arith.constant 0 : index
      %16 = vector.load %arg6[%c0_14, %c0_15] : memref<2x128xf32, #tpu.memory_space<vmem>>, vector<2x128xf32>
      tpu.vector_store %arg6[%c0_14, %c0_15], %15 {strides = array<i32>} : memref<2x128xf32, #tpu.memory_space<vmem>>, vector<2x128xf32>,
    } else {
    }
    return
  }
  func.func @transform_0(%arg0: i32, %arg1: i32, %arg2: i32) -> (i32, i32) {
    %c0_i32 = arith.constant 0 : i32
    return %arg0, %arg2 : i32, i32
  }
  func.func @transform_1(%arg0: i32, %arg1: i32, %arg2: i32) -> (i32, i32) {
    %c0_i32 = arith.constant 0 : i32
    return %arg2, %arg1 : i32, i32
  }
  func.func @transform_2(%arg0: i32, %arg1: i32, %arg2: i32) -> (i32, i32) {
    %c0_i32 = arith.constant 0 : i32
    %c0_i32_0 = arith.constant 0 : i32
    return %c0_i32, %arg1 : i32, i32
  }
  func.func @transform_3(%arg0: i32, %arg1: i32, %arg2: i32) -> (i32, i32) {
    %c0_i32 = arith.constant 0 : i32
    return %arg0, %arg1 : i32, i32
  }
}

module attributes {stable_mosaic.version = 11 : i64} {
  func.func @_gemm_bias_act_kernel(%arg0: i32, %arg1: i32, %arg2: i32, %arg3: memref<8x288xbf16, #tpu.memory_space<vmem>>, %arg4: memref<288x128xbf16, #tpu.memory_space<vmem>>, %arg5: memref<1x128xf32, #tpu.memory_space<vmem>>, %arg6: memref<8x128xf32, #tpu.memory_space<vmem>>, %arg7: memref<8x128xf32, #tpu.memory_space<vmem>>) attributes {dimension_semantics = [#tpu.dimension_semantics<parallel>, #tpu.dimension_semantics<parallel>, #tpu.dimension_semantics<arbitrary>], iteration_bounds = array<i64: 1, 1, 1>, scalar_prefetch = 0 : i64, scratch_operands = 1 : i64, tpu.core_type = #tpu.core_type<tc>, window_params = [{transform_indices = @transform_0, window_bounds = array<i64: 8, 288>}, {transform_indices = @transform_1, window_bounds = array<i64: 288, 128>}, {transform_indices = @transform_2, window_bounds = array<i64: 1, 128>}, {transform_indices = @transform_3, window_bounds = array<i64: 8, 128>}]} {
    %c0_i32 = arith.constant 0 : i32
    %0 = arith.cmpi eq, %arg2, %c0_i32 : i32
    %1 = arith.extui %0 : i1 to i32
    %c0_i32_0 = arith.constant 0 : i32
    %2 = arith.cmpi ne, %1, %c0_i32_0 : i32
    scf.if %2 {
      %cst_10 = arith.constant 0.000000e+00 : f32
      %12 = vector.broadcast %cst_10 : f32 to vector<8x128xf32>
      %c0_11 = arith.constant 0 : index
      %c0_12 = arith.constant 0 : index
      %13 = vector.load %arg7[%c0_11, %c0_12] : memref<8x128xf32, #tpu.memory_space<vmem>>, vector<8x128xf32>
      tpu.vector_store %arg7[%c0_11, %c0_12], %12 {strides = array<i32>} : memref<8x128xf32, #tpu.memory_space<vmem>>, vector<8x128xf32>,
    } else {
    }
    %c0 = arith.constant 0 : index
    %c0_1 = arith.constant 0 : index
    %3 = vector.load %arg7[%c0, %c0_1] : memref<8x128xf32, #tpu.memory_space<vmem>>, vector<8x128xf32>
    %c0_2 = arith.constant 0 : index
    %c0_3 = arith.constant 0 : index
    %4 = vector.load %arg3[%c0_2, %c0_3] : memref<8x288xbf16, #tpu.memory_space<vmem>>, vector<8x288xbf16>
    %c0_4 = arith.constant 0 : index
    %c0_5 = arith.constant 0 : index
    %5 = vector.load %arg4[%c0_4, %c0_5] : memref<288x128xbf16, #tpu.memory_space<vmem>>, vector<288x128xbf16>
    %cst = arith.constant dense<0.000000e+00> : vector<8x128xf32>
    %6 = tpu.matmul %4, %5, %cst {dimension_numbers = #tpu.dot_dimension_numbers<[1], [0], [0], [1], [0, 0, 1, 1], [], []>} : vector<8x288xbf16>, vector<288x128xbf16>, vector<8x128xf32> -> vector<8x128xf32>
    %7 = arith.addf %3, %6 : vector<8x128xf32>
    %c0_6 = arith.constant 0 : index
    %c0_7 = arith.constant 0 : index
    %8 = vector.load %arg7[%c0_6, %c0_7] : memref<8x128xf32, #tpu.memory_space<vmem>>, vector<8x128xf32>
    tpu.vector_store %arg7[%c0_6, %c0_7], %7 {strides = array<i32>} : memref<8x128xf32, #tpu.memory_space<vmem>>, vector<8x128xf32>,
    %c0_i32_8 = arith.constant 0 : i32
    %9 = arith.cmpi eq, %arg2, %c0_i32_8 : i32
    %10 = arith.extui %9 : i1 to i32
    %c0_i32_9 = arith.constant 0 : i32
    %11 = arith.cmpi ne, %10, %c0_i32_9 : i32
    scf.if %11 {
      %c0_10 = arith.constant 0 : index
      %c0_11 = arith.constant 0 : index
      %12 = vector.load %arg7[%c0_10, %c0_11] : memref<8x128xf32, #tpu.memory_space<vmem>>, vector<8x128xf32>
      %c0_12 = arith.constant 0 : index
      %c0_13 = arith.constant 0 : index
      %13 = vector.load %arg5[%c0_12, %c0_13] : memref<1x128xf32, #tpu.memory_space<vmem>>, vector<1x128xf32>
      %14 = vector.broadcast %13 : vector<1x128xf32> to vector<8x128xf32>
      %15 = arith.addf %12, %14 : vector<8x128xf32>
      %c0_14 = arith.constant 0 : index
      %c0_15 = arith.constant 0 : index
      %16 = vector.load %arg6[%c0_14, %c0_15] : memref<8x128xf32, #tpu.memory_space<vmem>>, vector<8x128xf32>
      tpu.vector_store %arg6[%c0_14, %c0_15], %15 {strides = array<i32>} : memref<8x128xf32, #tpu.memory_space<vmem>>, vector<8x128xf32>,
    } else {
    }
    return
  }
  func.func @transform_0(%arg0: i32, %arg1: i32, %arg2: i32) -> (i32, i32) {
    %c0_i32 = arith.constant 0 : i32
    return %arg0, %arg2 : i32, i32
  }
  func.func @transform_1(%arg0: i32, %arg1: i32, %arg2: i32) -> (i32, i32) {
    %c0_i32 = arith.constant 0 : i32
    return %arg2, %arg1 : i32, i32
  }
  func.func @transform_2(%arg0: i32, %arg1: i32, %arg2: i32) -> (i32, i32) {
    %c0_i32 = arith.constant 0 : i32
    %c0_i32_0 = arith.constant 0 : i32
    return %c0_i32, %arg1 : i32, i32
  }
  func.func @transform_3(%arg0: i32, %arg1: i32, %arg2: i32) -> (i32, i32) {
    %c0_i32 = arith.constant 0 : i32
    return %arg0, %arg1 : i32, i32
  }
}

</mosaic_0001>

<bundles_post_ra>
// kernel: forward.5
= control target key start
LH: loop header
LB: loop body
LE: loop exit
PB: predicated region body
PF: predicated region fallthrough
CT: control target
= control target key end

     0   :  { %s793_s12 = smov 0   ;;  %s795_s13 = smov 0   ;;  %s845_s0 = inlined_call_operand.vmem [shape: bf16[128,48], index: 0, kind: input, shape index: {}]   ;;  %s846_s1 = inlined_call_operand.vmem [shape: bf16[48,128], index: 1, kind: input, shape index: {}]   ;;  %s847_s2 = inlined_call_operand.vmem [shape: f32[1,128], index: 2, kind: input, shape index: {}]   ;;  %s848_s3 = inlined_call_operand.vmem [shape: bf16[128,128], index: 3, kind: output, shape index: {}]  }
   0x1   :  { %s797_s14 = smov 0  }
   0x2 LB: > { %s32_s15 = sadd.s32 1, %s767_s13  ;;  %p633_p0 = scmp.ge.s32.totalorder %s771_s14, 1  ;;  %s771_s14 = sphi %s797_s14, %s13_s14   ;;  %s767_s13 = sphi %s795_s13, %s850_s13   ;;  %s763_s12 = sphi %s793_s12, %s849_s12  }
   0x3   : > { %p34_p1 = scmp.ge.s32.totalorder %s32_s15, 2  ;;  %p188_p2 = scmp.lt.s32.totalorder %s771_s14, 3 }
   0x5   : > { %s852_s15 = smov (%p34_p1, %s32_s15), 0  ;;  %p189_p3 = pnand %p633_p0, %p188_p2 }
   0x6   : > { %s634_s18 = sshll.u32 (!%p189_p3), %s763_s12, 3 }
   0x7   : > { %192 = sbr.rel (%p189_p3) target bundleno = 234 (0xea), region = 32  ;;  %p230_p4 = scmp.lt.s32.totalorder (!%p189_p3), %s634_s18, 15 }
   0xc   : > { %v742_v0 = vld [vmem:[%s846_s1 + $0x10] sm:$0xff]   ;;  %v743_v1 = vld [vmem:[%s846_s1 + $0x8] sm:$0xff]   ;;  %s854_s18 = smov (!%p230_p4, %s634_s18), 15  ;;  %v744_v2 = vld [vmem:[%s846_s1] sm:$0xff]   ;;  %vm332_vm0 = vcmask 392192  }
   0xd   : > { %698 = vmatprep.subr.bf16.mxu0 %v742_v0  ;;  %712 = vmatprep.subr.bf16.mxu1 %v742_v0  ;;  %s635_s23 = sshll.u32 %s854_s18, 2  ;;  %v649_v7 = vld [vmem:[%s847_s2] ss:$0 sm:$0xff] }
   0xe   : > { %699 = vmatpush3.bf16.msra.mxu0 %v742_v0  ;;  %715 = vmatpush3.bf16.msra.mxu1 %v742_v0  ;;  %s236_s26 = scalar_lea.vmem %s845_s0, %s635_s23  ;;  %s257_s4 = scalar_lea.vmem %s848_s3, %s635_s23 }
   0xf   : > { %700 = vmatprep.subr.bf16.mxu0 %v743_v1  ;;  %713 = vmatprep.subr.bf16.mxu1 %v743_v1  ;;  %v745_v3 = vld [vmem:[%s236_s26] sm:$0xff]   ;;  %v746_v4 = vld [vmem:[%s236_s26 + $0x10] sm:$0xff]   ;;  %v747_v5 = vld [vmem:[%s236_s26 + $0x8] sm:$0xff]  }
  0x10   : > { %704 = vmatprep.mubr.msk.bf16.mxu0 %vm332_vm0, %v745_v3  ;;  %708 = vmatprep.mubr.msk.bf16.mxu1 %vm332_vm0, %v746_v4  ;;  %v748_v6 = vld [vmem:[%s236_s26 + $0x18] sm:$0xff]  }
  0x12   : > { %701 = vmatpush3.bf16.msra.mxu0 %v743_v1  ;;  %716 = vmatpush3.bf16.msra.mxu1 %v743_v1 }
  0x13   : > { %702 = vmatprep.subr.bf16.mxu0 %v744_v2  ;;  %714 = vmatprep.subr.bf16.mxu1 %v744_v2 }
  0x16   : > { %703 = vmatpush3.bf16.msra.mxu0 %v744_v2  ;;  %717 = vmatpush3.bf16.msra.mxu1 %v744_v2 }
  0x19   : > { %705 = vmatmul.mubr.msk.bf16.vlgmr.msra.gmra.mxu0 %vm332_vm0, %v747_v5  ;;  %709 = vmatmul.mubr.msk.bf16.vlgmr.msra.gmra.mxu1 %vm332_vm0, %v748_v6 }
  0xd9   : > { %v706_v8 = vpop.f32.mrf.mxu0  ;;  %v710_v9 = vpop.f32.mrf.mxu1 }
  0xda   : > { %v446_v10 = vadd.f32 %v706_v8, %v649_v7  ;;  %v450_v11 = vadd.f32 %v710_v9, %v649_v7 }
  0xdb   : > { %v379_v12 = vpop.f32.mrf.mxu0  ;;  %v395_v13 = vpop.f32.mrf.mxu1 }
  0xdc   : > { %vm454_vm1 = vcmp.ge.f32.partialorder %v446_v10, 0.0  ;;  %v462_v14 = vmul.f32 0.01, %v446_v10  ;;  %vm458_vm2 = vcmp.ge.f32.partialorder %v450_v11, 0.0  ;;  %v466_v15 = vmul.f32 0.01, %v450_v11 }
  0xdd   : > { %v444_v16 = vadd.f32 %v649_v7, %v379_v12  ;;  %v707_v17 = vpop.f32.mrf.mxu0  ;;  %v711_v18 = vpop.f32.mrf.mxu1  ;;  %v448_v19 = vadd.f32 %v649_v7, %v395_v13 }
  0xde   : > { %v447_v20 = vadd.f32 %v707_v17, %v649_v7  ;;  %v451_v21 = vadd.f32 %v711_v18, %v649_v7  ;;  %v470_v22 = vsel %vm454_vm1, %v446_v10, %v462_v14  ;;  %v474_v23 = vsel %vm458_vm2, %v450_v11, %v466_v15 }
  0xdf   : > { %v382_v24 = vpop.f32.mrf.mxu0  ;;  %v398_v25 = vpop.f32.mrf.mxu1  ;;  %vm452_vm5 = vcmp.ge.f32.partialorder %v444_v16, 0.0  ;;  %v460_v28 = vmul.f32 0.01, %v444_v16  ;;  %vm456_vm6 = vcmp.ge.f32.partialorder %v448_v19, 0.0  ;;  %v464_v31 = vmul.f32 0.01, %v448_v19 }
  0xe0   : > { %vm455_vm3 = vcmp.ge.f32.partialorder %v447_v20, 0.0  ;;  %v463_v26 = vmul.f32 0.01, %v447_v20  ;;  %vm459_vm4 = vcmp.ge.f32.partialorder %v451_v21, 0.0  ;;  %v467_v27 = vmul.f32 0.01, %v451_v21 }
  0xe1   : > { %v445_v29 = vadd.f32 %v649_v7, %v382_v24  ;;  %v449_v30 = vadd.f32 %v649_v7, %v398_v25  ;;  %v468_v38 = vsel %vm452_vm5, %v444_v16, %v460_v28  ;;  %v472_v40 = vsel %vm456_vm6, %v448_v19, %v464_v31 }
  0xe2   : > { %v471_v32 = vsel %vm455_vm3, %v447_v20, %v463_v26  ;;  %v475_v33 = vsel %vm459_vm4, %v451_v21, %v467_v27 }
  0xe3   : > { %v676_v34 = vpack.c.bf16 %v471_v32, %v470_v22  ;;  %v686_v35 = vpack.c.bf16 %v475_v33, %v474_v23  ;;  %vm453_vm7 = vcmp.ge.f32.partialorder %v445_v29, 0.0  ;;  %v461_v36 = vmul.f32 0.01, %v445_v29 }
  0xe4   : > { %vm457_vm8 = vcmp.ge.f32.partialorder %v449_v30, 0.0  ;;  %v465_v37 = vmul.f32 0.01, %v449_v30 }
  0xe5   : > { %688 = vst [vmem:[%s257_s4 + $0x8] sm:$0xff] %v676_v34   ;;  %690 = vst [vmem:[%s257_s4 + $0x18] sm:$0xff] %v686_v35   ;;  %v469_v39 = vsel %vm453_vm7, %v445_v29, %v461_v36 }
  0xe6   : > { %v671_v41 = vpack.c.bf16 %v469_v39, %v468_v38  ;;  %v473_v42 = vsel %vm457_vm8, %v449_v30, %v465_v37 }
  0xe7   : > { %v681_v43 = vpack.c.bf16 %v473_v42, %v472_v40 }
  0xe8   : > { %672 = vst [vmem:[%s257_s4] sm:$0xff] %v671_v41  }
  0xe9   : > { %689 = vst [vmem:[%s257_s4 + $0x10] sm:$0xff] %v681_v43  }
  0xea PF: > { %s13_s14 = sadd.s32 1, %s771_s14   ;;  %s849_s12 = smov %s767_s13 }
  0xeb   : > { %p10_p5 = scmp.ge.s32.totalorder %s13_s14, 4   ;;  %s850_s13 = smov %s852_s15 }
  0xed   :  { %12 = sbr.rel (!%p10_p5) target bundleno = 2 (0x2), region = 76 }

// kernel: forward.6
= control target key start
LH: loop header
LB: loop body
LE: loop exit
PB: predicated region body
PF: predicated region fallthrough
CT: control target
= control target key end

     0   :  { %s668_s12 = smov 0   ;;  %s670_s13 = smov 0   ;;  %s735_s0 = inlined_call_operand.vmem [shape: bf16[32,128], index: 0, kind: input, shape index: {}]   ;;  %s736_s1 = inlined_call_operand.vmem [shape: bf16[128,128], index: 1, kind: input, shape index: {}]   ;;  %s737_s2 = inlined_call_operand.vmem [shape: f32[1,128], index: 2, kind: input, shape index: {}]   ;;  %s738_s3 = inlined_call_operand.vmem [shape: bf16[32,128], index: 3, kind: output, shape index: {}]  }
   0x1   :  { %s672_s14 = smov 0  }
   0x2 LB: > { %s32_s15 = sadd.s32 1, %s640_s13  ;;  %p532_p0 = scmp.ge.s32.totalorder %s644_s14, 1  ;;  %s644_s14 = sphi %s672_s14, %s13_s14   ;;  %s640_s13 = sphi %s670_s13, %s740_s13   ;;  %s636_s12 = sphi %s668_s12, %s739_s12  }
   0x3   : > { %p34_p1 = scmp.ge.s32.totalorder %s32_s15, 2  ;;  %p188_p2 = scmp.lt.s32.totalorder %s644_s14, 3 }
   0x5   : > { %s742_s15 = smov (%p34_p1, %s32_s15), 0  ;;  %p189_p3 = pnand %p532_p0, %p188_p2 }
   0x6   : > { %s533_s20 = sshll.u32 (!%p189_p3), %s636_s12, 1 }
   0x7   : > { %192 = sbr.rel (%p189_p3) target bundleno = 250 (0xfa), region = 32  ;;  %p230_p4 = scmp.lt.s32.totalorder (!%p189_p3), %s533_s20, 3 }
   0xc   : > { %v613_v0 = vld [vmem:[%s736_s1 + $0x38] sm:$0xff]   ;;  %v646_v1 = vmov 0.0   ;;  %v614_v2 = vld [vmem:[%s736_s1 + $0x30] sm:$0xff]   ;;  %vm647_vm0 = vmmov 0   ;;  %s744_s20 = smov (!%p230_p4, %s533_s20), 3  ;;  %v615_v3 = vld [vmem:[%s736_s1 + $0x28] sm:$0xff]  }
   0xd   : > { %567 = vmatprep.subr.bf16.mxu0 %v646_v1  ;;  %583 = vmatprep.mubr.msk.bf16.mxu0 %vm647_vm0, %v646_v1  ;;  %s534_s23 = sshll.u32 %s744_s20, 2  ;;  %v616_v4 = vld [vmem:[%s736_s1 + $0x20] sm:$0xff]   ;;  %v617_v5 = vld [vmem:[%s736_s1 + $0x18] sm:$0xff]   ;;  %v618_v6 = vld [vmem:[%s736_s1 + $0x10] sm:$0xff]  }
   0xe   : > { %568 = vmatpush3.bf16.msra.mxu0 %v613_v0  ;;  %s236_s26 = scalar_lea.vmem %s735_s0, %s534_s23  ;;  %v619_v7 = vld [vmem:[%s736_s1 + $0x8] sm:$0xff]   ;;  %v620_v8 = vld [vmem:[%s736_s1] sm:$0xff]   ;;  %s257_s17 = scalar_lea.vmem %s738_s3, %s534_s23 }
   0xf   : > { %569 = vmatprep.subr.bf16.mxu0 %v646_v1  ;;  %v621_v9 = vld [vmem:[%s236_s26] sm:$0xff]  }
  0x10   : > { %v546_v10 = vld [vmem:[%s737_s2] ss:$0 sm:$0xff] }
  0x12   : > { %570 = vmatpush3.bf16.msra.mxu0 %v614_v2 }
  0x13   : > { %571 = vmatprep.subr.bf16.mxu0 %v646_v1 }
  0x16   : > { %572 = vmatpush3.bf16.msra.mxu0 %v615_v3 }
  0x17   : > { %573 = vmatprep.subr.bf16.mxu0 %v646_v1 }
  0x1a   : > { %574 = vmatpush3.bf16.msra.mxu0 %v616_v4 }
  0x1b   : > { %575 = vmatprep.subr.bf16.mxu0 %v646_v1 }
  0x1e   : > { %576 = vmatpush3.bf16.msra.mxu0 %v617_v5 }
  0x1f   : > { %577 = vmatprep.subr.bf16.mxu0 %v646_v1 }
  0x22   : > { %578 = vmatpush3.bf16.msra.mxu0 %v618_v6 }
  0x23   : > { %579 = vmatprep.subr.bf16.mxu0 %v646_v1 }
  0x26   : > { %580 = vmatpush3.bf16.msra.mxu0 %v619_v7 }
  0x27   : > { %581 = vmatprep.subr.bf16.mxu0 %v646_v1 }
  0x2a   : > { %582 = vmatpush3.bf16.msra.mxu0 %v620_v8 }
  0x2d   : > { %584 = vmatmul.mubr.bf16.vlgmr.msra.gmra.mxu0 %v621_v9 }
  0xed   : > { %v374_v11 = vpop.f32.mrf.mxu0 }
  0xee   : > { %v397_v12 = vadd.f32 %v546_v10, %v374_v11 }
  0xef   : > { %v585_v13 = vpop.f32.mrf.mxu0 }
  0xf0   : > { %v401_v15 = vmul.f32 0.01, %v397_v12  ;;  %vm399_vm1 = vcmp.ge.f32.partialorder %v397_v12, 0.0 }
  0xf1   : > { %v377_v14 = vpop.f32.mrf.mxu0 }
  0xf2   : > { %v398_v16 = vadd.f32 %v546_v10, %v377_v14  ;;  %v403_v19 = vsel %vm399_vm1, %v397_v12, %v401_v15 }
  0xf3   : > { %v586_v17 = vpop.f32.mrf.mxu0 }
  0xf4   : > { %vm400_vm2 = vcmp.ge.f32.partialorder %v398_v16, 0.0  ;;  %v402_v18 = vmul.f32 0.01, %v398_v16 }
  0xf6   : > { %v404_v20 = vsel %vm400_vm2, %v398_v16, %v402_v18 }
  0xf7   : > { %v556_v21 = vpack.c.bf16 %v404_v20, %v403_v19 }
  0xf9   : > { %557 = vst [vmem:[%s257_s17] sm:$0xff] %v556_v21  }
  0xfa PF: > { %s13_s14 = sadd.s32 1, %s644_s14   ;;  %s739_s12 = smov %s640_s13 }
  0xfb   : > { %p10_p5 = scmp.ge.s32.totalorder %s13_s14, 4   ;;  %s740_s13 = smov %s742_s15 }
  0xfd   :  { %12 = sbr.rel (!%p10_p5) target bundleno = 2 (0x2), region = 76 }

// kernel: forward.7
= control target key start
LH: loop header
LB: loop body
LE: loop exit
PB: predicated region body
PF: predicated region fallthrough
CT: control target
= control target key end

     0   :  { %s356_s1 = inlined_call_operand.vmem [shape: bf16[256,128], index: 1, kind: input, shape index: {}]   ;;  %s357_s0 = inlined_call_operand.vmem [shape: bf16[8,256], index: 0, kind: input, shape index: {}]   ;;  %s358_s2 = inlined_call_operand.vmem [shape: f32[1,128], index: 2, kind: input, shape index: {}]   ;;  %s359_s3 = inlined_call_operand.vmem [shape: bf16[8,128], index: 3, kind: output, shape index: {}]  }
   0x1   :  { %v261_v0 = vld [vmem:[%s356_s1 + $0x78] sm:$0xff]   ;;  %v263_v2 = vld [vmem:[%s356_s1 + $0x70] sm:$0xff]   ;;  %v265_v4 = vld [vmem:[%s356_s1 + $0x68] sm:$0xff]  }
   0x2   :  { %v262_v1 = vld [vmem:[%s356_s1 + $0x38] sm:$0xff]   ;;  %239 = vmatprep.subr.bf16.mxu0 %v261_v0  ;;  %v264_v3 = vld [vmem:[%s356_s1 + $0x30] sm:$0xff]   ;;  %v266_v5 = vld [vmem:[%s356_s1 + $0x28] sm:$0xff]  }
   0x3   :  { %240 = vmatpush3.bf16.msra.mxu0 %v262_v1  ;;  %v267_v6 = vld [vmem:[%s356_s1 + $0x60] sm:$0xff]   ;;  %v269_v8 = vld [vmem:[%s356_s1 + $0x58] sm:$0xff]   ;;  %v271_v10 = vld [vmem:[%s356_s1 + $0x50] sm:$0xff]  }
   0x4   :  { %241 = vmatprep.subr.bf16.mxu0 %v263_v2  ;;  %v268_v7 = vld [vmem:[%s356_s1 + $0x20] sm:$0xff]   ;;  %v270_v9 = vld [vmem:[%s356_s1 + $0x18] sm:$0xff]   ;;  %v272_v13 = vld [vmem:[%s356_s1 + $0x10] sm:$0xff]  }
   0x5   :  { %v21_v11 = vld [vmem:[%s357_s0] sm:$0xff]  ;;  %v273_v14 = vld [vmem:[%s356_s1 + $0x48] sm:$0xff]  }
   0x6   :  { %v221_v12 = vcombine.high %v21_v11, %v21_v11  ;;  %v274_v15 = vld [vmem:[%s356_s1 + $0x8] sm:$0xff]   ;;  %v275_v16 = vld [vmem:[%s356_s1 + $0x40] sm:$0xff]   ;;  %v220_v18 = vcombine.low %v21_v11, %v21_v11 }
   0x7   :  { %242 = vmatpush3.bf16.msra.mxu0 %v264_v3  ;;  %v276_v17 = vld [vmem:[%s356_s1] sm:$0xff]  }
   0x8   :  { %243 = vmatprep.subr.bf16.mxu0 %v265_v4  ;;  %189 = vmatprep.mubr.bf16.mxu0 %v221_v12  ;;  %v238_v21 = vld [vmem:[%s358_s2] ss:$0 sm:$0xff] }
   0xb   :  { %244 = vmatpush3.bf16.msra.mxu0 %v266_v5 }
   0xc   :  { %245 = vmatprep.subr.bf16.mxu0 %v267_v6 }
   0xf   :  { %246 = vmatpush3.bf16.msra.mxu0 %v268_v7 }
  0x10   :  { %247 = vmatprep.subr.bf16.mxu0 %v269_v8 }
  0x13   :  { %248 = vmatpush3.bf16.msra.mxu0 %v270_v9 }
  0x14   :  { %249 = vmatprep.subr.bf16.mxu0 %v271_v10 }
  0x17   :  { %250 = vmatpush3.bf16.msra.mxu0 %v272_v13 }
  0x18   :  { %251 = vmatprep.subr.bf16.mxu0 %v273_v14 }
  0x1b   :  { %252 = vmatpush3.bf16.msra.mxu0 %v274_v15 }
  0x1c   :  { %253 = vmatprep.subr.bf16.mxu0 %v275_v16 }
  0x1f   :  { %254 = vmatpush3.bf16.msra.mxu0 %v276_v17 }
  0x22   :  { %190 = vmatmul.mubr.bf16.vlgmr.msra.gmra.mxu0 %v220_v18 }
  0xe2   :  { %v255_v19 = vpop.f32.mrf.mxu0 }
  0xe4   :  { %v256_v20 = vpop.f32.mrf.mxu0 }
  0xe5   :  { %v257_v22 = vadd.f32 %v256_v20, %v255_v19 }
  0xe6   :  { %v258_v23 = vpop.f32.mrf.mxu0 }
  0xe7   :  { %v210_v24 = vadd.f32 %v257_v22, %v238_v21 }
  0xe8   :  { %v259_v25 = vpop.f32.mrf.mxu0 }
  0xe9   :  { %vm211_vm0 = vcmp.ge.f32.partialorder %v210_v24, 0.0  ;;  %v212_v26 = vmul.f32 0.01, %v210_v24 }
  0xeb   :  { %v213_v27 = vsel %vm211_vm0, %v210_v24, %v212_v26 }
  0xec   :  { %v214_v28 = vpack.c.bf16 %v213_v27, %v213_v27 }
  0xee   :  { %215 = vst [vmem:[%s359_s3] sm:$0xf] %v214_v28 }

// kernel: forward.9
= control target key start
LH: loop header
LB: loop body
LE: loop exit
PB: predicated region body
PF: predicated region fallthrough
CT: control target
= control target key end

     0   :  { %v227_v1 = vmov 0.0   ;;  %vm228_vm0 = vmmov 0   ;;  %s283_s0 = inlined_call_operand.vmem [shape: bf16[2,128], index: 0, kind: input, shape index: {}]   ;;  %s284_s1 = inlined_call_operand.vmem [shape: bf16[128,128], index: 1, kind: input, shape index: {}]   ;;  %s285_s2 = inlined_call_operand.vmem [shape: f32[1,128], index: 2, kind: input, shape index: {}]   ;;  %s286_s3 = inlined_call_operand.hbm [shape: f32[2,128], index: 3, kind: output, shape index: {}]  }
   0x1   :  { %v197_v0 = vld [vmem:[%s284_s1 + $0x38] sm:$0xff]   ;;  %174 = vmatprep.subr.bf16.mxu0 %v227_v1  ;;  %20 = vst [vmem:[#allocation2] sm:$0x3] %v227_v1  ;;  %v198_v2 = vld [vmem:[%s284_s1 + $0x30] sm:$0xff]   ;;  %190 = vmatprep.mubr.msk.bf16.mxu0 %vm228_vm0, %v227_v1  ;;  %v199_v3 = vld [vmem:[%s284_s1 + $0x28] sm:$0xff]  }
   0x2   :  { %175 = vmatpush3.bf16.msra.mxu0 %v197_v0 }
   0x3   :  { %176 = vmatprep.subr.bf16.mxu0 %v227_v1 }
   0x6   :  { %177 = vmatpush3.bf16.msra.mxu0 %v198_v2 }
   0x7   :  { %178 = vmatprep.subr.bf16.mxu0 %v227_v1 }
   0x8   :  { %8 = vsyncpa [#allocation4], 0  ;;  %v200_v4 = vld [vmem:[%s284_s1 + $0x20] sm:$0xff]   ;;  %v201_v5 = vld [vmem:[%s284_s1 + $0x18] sm:$0xff]   ;;  %s229_s5 = smov [#allocation3]  }
   0x9   :  { %v202_v6 = vld [vmem:[%s284_s1 + $0x10] sm:$0xff]   ;;  %v203_v7 = vld [vmem:[%s284_s1 + $0x8] sm:$0xff]   ;;  %v204_v8 = vld [vmem:[%s284_s1] sm:$0xff]   ;;  %s148_s1 = sshll.u32 %s229_s5, 4  ;;  %s149_s1 = int_to_ptr.vmem [resolvable:$true] %s148_s1 }
   0xa   :  { %179 = vmatpush3.bf16.msra.mxu0 %v199_v3  ;;  %v22_v9 = vld [vmem:[%s283_s0] sm:$0x1]  ;;  %s205_s6 = scalar_lea.vmem %s149_s1, 32  ;;  %p210_p1 = scmp.lt.s32.totalorder %s149_s1, %s149_s1 }
   0xb   :  { %180 = vmatprep.subr.bf16.mxu0 %v227_v1  ;;  %v21_v10 = vld [vmem:[#allocation2] sm:$0x3]  ;;  %p206_p0 = scmp.ne.s32.totalorder %s149_s1, %s205_s6  ;;  %p211_p2 = scmp.lt.s32.totalorder %s205_s6, %s205_s6 }
   0xc   :  { %v164_v16 = vld [vmem:[%s285_s2] ss:$0 sm:$0xff] }
   0xd   :  { %p212_p3 = por %p211_p2, %p210_p1 }
   0xe   :  { %181 = vmatpush3.bf16.msra.mxu0 %v200_v4 }
   0xf   :  { %182 = vmatprep.subr.bf16.mxu0 %v227_v1  ;;  %p213_p4 = pnand %p212_p3, %p206_p0 }
  0x12   :  { %183 = vmatpush3.bf16.msra.mxu0 %v201_v5 }
  0x13   :  { %184 = vmatprep.subr.bf16.mxu0 %v227_v1 }
  0x16   :  { %185 = vmatpush3.bf16.msra.mxu0 %v202_v6 }
  0x17   :  { %186 = vmatprep.subr.bf16.mxu0 %v227_v1 }
  0x1a   :  { %187 = vmatpush3.bf16.msra.mxu0 %v203_v7 }
  0x1b   :  { %188 = vmatprep.subr.bf16.mxu0 %v227_v1 }
  0x1e   :  { %189 = vmatpush3.bf16.msra.mxu0 %v204_v8 }
  0x21   :  { %191 = vmatmul.mubr.bf16.vlgmr.msra.gmra.mxu0 %v22_v9 }
  0xe1   :  { %v121_v11 = vpop.f32.mrf.mxu0 }
  0xe2   :  { %v127_v12 = vadd.f32 %v121_v11, %v21_v10 }
  0xe3   :  { %v192_v13 = vpop.f32.mrf.mxu0 }
  0xe4   :  { %128 = vst [vmem:[#allocation2] sm:$0x3] %v127_v12 }
  0xe5   :  { %v124_v14 = vpop.f32.mrf.mxu0 }
  0xe7   :  { %v193_v15 = vpop.f32.mrf.mxu0 }
  0xeb   :  { %v132_v17 = vld [vmem:[#allocation2] sm:$0x3] }
  0xec   :  { %v140_v18 = vadd.f32 %v164_v16, %v132_v17 }
  0xee   :  { %141 = vst [vmem:[#allocation3] sm:$0x3] %v140_v18 }
  0xef   :  { %216 = shalt.err (!%p213_p4)
}
  0xf0   :  { %151 = dma.vmem_to_hbm [thread:$0]  %s149_s1, 32, %s286_s3, [#allocation4]  }
  0xf1   :  { %225 = dma.done.wait [#allocation4], 32  }
  0xf2   :  { %226 = vsyncadd [#allocation4], 4294967264 }
  0xf3   :  { %155 = vsyncpa [#allocation4], 1 }

// kernel: forward.8
= control target key start
LH: loop header
LB: loop body
LE: loop exit
PB: predicated region body
PF: predicated region fallthrough
CT: control target
= control target key end

     0   :  { %v359_v1 = vmov 0.0   ;;  %vm360_vm0 = vmmov 0   ;;  %vm177_vm1 = vcmask 261120   ;;  %s447_s1 = inlined_call_operand.vmem [shape: bf16[288,128], index: 1, kind: input, shape index: {}]   ;;  %s448_s0 = inlined_call_operand.vmem [shape: bf16[8,288], index: 0, kind: input, shape index: {}]   ;;  %s449_s2 = inlined_call_operand.vmem [shape: f32[1,128], index: 2, kind: input, shape index: {}]   ;;  %s450_s3 = inlined_call_operand.vmem [shape: f32[8,128], index: 3, kind: output, shape index: {}]  }
   0x1   :  { %v338_v0 = vld [vmem:[%s447_s1 + $0x78] sm:$0xff]   ;;  %328 = vmatprep.subr.bf16.mxu1 %v359_v1  ;;  %332 = vmatprep.mubr.msk.bf16.mxu1 %vm360_vm0, %v359_v1  ;;  %v340_v3 = vld [vmem:[%s447_s1 + $0x70] sm:$0xff]   ;;  %v342_v5 = vld [vmem:[%s447_s1 + $0x68] sm:$0xff]  }
   0x2   :  { %v339_v2 = vld [vmem:[%s447_s1 + $0x38] sm:$0xff]   ;;  %303 = vmatprep.subr.bf16.mxu0 %v338_v0  ;;  %v341_v4 = vld [vmem:[%s447_s1 + $0x30] sm:$0xff]   ;;  %v343_v6 = vld [vmem:[%s447_s1 + $0x28] sm:$0xff]  }
   0x3   :  { %304 = vmatpush3.bf16.msra.mxu0 %v339_v2  ;;  %v344_v7 = vld [vmem:[%s447_s1 + $0x60] sm:$0xff]   ;;  %v346_v9 = vld [vmem:[%s447_s1 + $0x58] sm:$0xff]   ;;  %v350_v10 = vld [vmem:[%s447_s1 + $0x88] sm:$0xff]  }
   0x4   :  { %305 = vmatprep.subr.bf16.mxu0 %v340_v3  ;;  %v345_v8 = vld [vmem:[%s447_s1 + $0x20] sm:$0xff]   ;;  %v347_v11 = vld [vmem:[%s447_s1 + $0x18] sm:$0xff]   ;;  %329 = vmatpush3.bf16.msra.mxu1 %v350_v10  ;;  %v348_v13 = vld [vmem:[%s447_s1 + $0x50] sm:$0xff]  }
   0x5   :  { %330 = vmatprep.subr.bf16.mxu1 %v359_v1  ;;  %v353_v12 = vld [vmem:[%s447_s1 + $0x80] sm:$0xff]   ;;  %v356_v14 = vld [vmem:[%s448_s0 + $0x8] ss:$0 sps:$4 sm:$0xff]   ;;  %v349_v16 = vld [vmem:[%s447_s1 + $0x10] sm:$0xff]  }
   0x6   :  { %v21_v15 = vld [vmem:[%s448_s0] sm:$0xff]  ;;  %v351_v18 = vld [vmem:[%s447_s1 + $0x48] sm:$0xff]  }
   0x7   :  { %306 = vmatpush3.bf16.msra.mxu0 %v341_v4  ;;  %v281_v17 = vcombine.high %v21_v15, %v21_v15  ;;  %v352_v19 = vld [vmem:[%s447_s1 + $0x8] sm:$0xff]   ;;  %v354_v20 = vld [vmem:[%s447_s1 + $0x40] sm:$0xff]   ;;  %v280_v22 = vcombine.low %v21_v15, %v21_v15 }
   0x8   :  { %307 = vmatprep.subr.bf16.mxu0 %v342_v5  ;;  %331 = vmatpush3.bf16.msra.mxu1 %v353_v12  ;;  %v355_v21 = vld [vmem:[%s447_s1] sm:$0xff]  }
   0x9   :  { %213 = vmatprep.mubr.bf16.mxu0 %v281_v17  ;;  %v302_v30 = vld [vmem:[%s449_s2] ss:$0 sm:$0xff] }
   0xb   :  { %308 = vmatpush3.bf16.msra.mxu0 %v343_v6  ;;  %333 = vmatmul.mubr.msk.bf16.vlgmr.msra.gmra.mxu1 %vm177_vm1, %v356_v14 }
   0xc   :  { %309 = vmatprep.subr.bf16.mxu0 %v344_v7 }
   0xf   :  { %310 = vmatpush3.bf16.msra.mxu0 %v345_v8 }
  0x10   :  { %311 = vmatprep.subr.bf16.mxu0 %v346_v9 }
  0x13   :  { %312 = vmatpush3.bf16.msra.mxu0 %v347_v11 }
  0x14   :  { %313 = vmatprep.subr.bf16.mxu0 %v348_v13 }
  0x17   :  { %314 = vmatpush3.bf16.msra.mxu0 %v349_v16 }
  0x18   :  { %315 = vmatprep.subr.bf16.mxu0 %v351_v18 }
  0x1b   :  { %316 = vmatpush3.bf16.msra.mxu0 %v352_v19 }
  0x1c   :  { %317 = vmatprep.subr.bf16.mxu0 %v354_v20 }
  0x1f   :  { %318 = vmatpush3.bf16.msra.mxu0 %v355_v21 }
  0x22   :  { %214 = vmatmul.mubr.bf16.vlgmr.msra.gmra.mxu0 %v280_v22 }
  0xcb   :  { %v255_v23 = vpop.f32.mrf.mxu1 }
  0xcd   :  { %v334_v24 = vpop.f32.mrf.mxu1 }
  0xcf   :  { %v258_v25 = vpop.f32.mrf.mxu1 }
  0xd1   :  { %v335_v26 = vpop.f32.mrf.mxu1 }
  0xe2   :  { %v319_v27 = vpop.f32.mrf.mxu0 }
  0xe4   :  { %v320_v28 = vpop.f32.mrf.mxu0 }
  0xe5   :  { %v321_v29 = vadd.f32 %v320_v28, %v319_v27 }
  0xe6   :  { %v322_v31 = vpop.f32.mrf.mxu0 }
  0xe7   :  { %v256_v32 = vadd.f32 %v321_v29, %v255_v23 }
  0xe8   :  { %v323_v33 = vpop.f32.mrf.mxu0 }
  0xe9   :  { %v274_v34 = vadd.f32 %v302_v30, %v256_v32 }
  0xeb   :  { %275 = vst [vmem:[%s450_s3] sm:$0xff] %v274_v34 }

</bundles_post_ra>
